<compile_context>
chip_gen: v5e
topology: v5e:2x2
jax: 0.10.0
libtpu: 0.0.40
codegen_flags: <defaults>
</compile_context>

<pallas_src>
import numpy as np
import jax
import jax.numpy as jnp
from jax.experimental import pallas as pl
from jax.experimental.pallas import tpu as pltpu

# --- module hyper-parameters (small, consistent with the module's __init__) ---
N_WORDS = 64        # word vocab size; padding_idx = N_WORDS
N_TAGS = 16         # POS tag set size; padding_idx = N_TAGS
WORD_EMBS_DIM = 32  # args.word_embs_dim
POS_EMBS_DIM = 16   # args.pos_embs_dim
OUT_DIM = WORD_EMBS_DIM + POS_EMBS_DIM   # sum_features=False -> concat

_LANE = 128
_SUBLANE = 8


def _round_up(x, m):
    return (x + m - 1) // m * m


def _feature_kernel(ids_ref, tab_ref, out_ref):
    """Fused word+POS embedding lookup for one token tile.

    ids_ref : (TN, 2) int32  col 0 = word ids (rows [0, Vw) of fused table),
                             col 1 = tag ids pre-offset by Vw (rows [Vw, Vw+Vt))
    tab_ref : (Vp, D) f32    block-diagonal fused embedding table (resident)
    out_ref : (TN, D) f32    token-major output tile
    """
    vp = tab_ref.shape[0]
    tn = ids_ref.shape[0]

    w_ids = ids_ref[:, 0:1]   # (TN, 1)
    t_ids = ids_ref[:, 1:2]   # (TN, 1), already offset by Vw on the host

    # Two-hot LHS mask (TN, Vp): each row selects the word row and the (offset)
    # tag row of the fused table.  Word rows and tag rows occupy disjoint row
    # ranges (invariant asserted at init), so one standard MXU contraction
    # performs the gather AND the concatenation (sum_features=False).
    col = jax.lax.broadcasted_iota(jnp.int32, (tn, vp), 1)
    two_hot = jnp.logical_or(col == w_ids, col == t_ids).astype(jnp.float32)

    # (TN, Vp) x (Vp, D) -> (TN, D): canonical lhs-dim-1 / rhs-dim-0 contraction,
    # no Mosaic-inserted operand relayout.  Mask is exactly 0/1, so every output
    # element equals a single f32 table entry (numerics verified vs jnp.take).
    out_ref[...] = jax.lax.dot_general(
        two_hot, tab_ref[...],
        dimension_numbers=(((1,), (0,)), ((), ())),
        preferred_element_type=jnp.float32)


class FeatureExtractor:
    """Eval-mode forward of FeatureExtractionModule (word+pos embeddings,
    sum_features=False, flat=False).  Static work is done once here."""

    def __init__(self, word_table, pos_table, *, token_tile=2048):
        assert token_tile % _LANE == 0, "token_tile must be a multiple of 128"
        self.token_tile = token_tile

        self.vw1, self.dw = word_table.shape   # N_WORDS + 1, Dw
        self.vt1, self.dt = pos_table.shape    # N_TAGS  + 1, Dt
        self.d_out = self.dw + self.dt
        self.word_pad_idx = self.vw1 - 1       # == N_WORDS
        self.tag_pad_idx = self.vt1 - 1        # == N_TAGS

        # Invariant for the two-hot trick: word rows [0, vw1) and offset tag
        # rows [vw1, vw1+vt1) are disjoint by construction.
        self.vp = _round_up(self.vw1 + self.vt1, _SUBLANE)
        assert self.vw1 + self.vt1 <= self.vp

        # Block-diagonal fused table (Vp, Dw+Dt), built once on device.
        tab = jnp.zeros((self.vp, self.d_out), dtype=jnp.float32)
        tab = tab.at[:self.vw1, :self.dw].set(word_table.astype(jnp.float32))
        tab = tab.at[self.vw1:self.vw1 + self.vt1, self.dw:].set(
            pos_table.astype(jnp.float32))
        self.fused_table = tab

        self._fns = {}   # (n_pad, tn) -> jitted pallas_call

    def _get_fn(self, n_pad, tn):
        key = (n_pad, tn)
        fn = self._fns.get(key)
        if fn is None:
            vp, d_out = self.vp, self.d_out
            fn = jax.jit(pl.pallas_call(
                _feature_kernel,
                out_shape=jax.ShapeDtypeStruct((n_pad, d_out), jnp.float32),
                grid=(n_pad // tn,),
                in_specs=[
                    pl.BlockSpec((tn, 2), lambda i: (i, 0)),       # packed ids
                    pl.BlockSpec((vp, d_out), lambda i: (0, 0)),   # fused table
                ],
                out_specs=pl.BlockSpec((tn, d_out), lambda i: (i, 0)),
                compiler_params=pltpu.CompilerParams(
                    dimension_semantics=("parallel",),   # >=2 steps -> v7x 2 TCs
                    vmem_limit_bytes=48 * 1024 * 1024),  # headroom for big tiles
            ))
            self._fns[key] = fn
        return fn

    def __call__(self, word_id_seqs, tag_id_seqs):
        lengths = [len(s) for s in word_id_seqs]
        batch = len(word_id_seqs)
        t_max = max(lengths) if batch else 0
        if batch == 0 or t_max == 0:
            return jnp.zeros((batch, t_max, self.d_out), jnp.float32), lengths

        n_real = int(sum(lengths))
        lengths_np = np.asarray(lengths, dtype=np.int64)

        # Vectorized pad_sequence(batch_first=True, padding_value=padding_idx);
        # empty sequences are handled naturally (their mask row is all False).
        mask = np.arange(t_max)[None, :] < lengths_np[:, None]
        padded_w = np.full((batch, t_max), self.word_pad_idx, dtype=np.int32)
        padded_t = np.full((batch, t_max), self.tag_pad_idx, dtype=np.int32)
        if n_real > 0:
            all_w = np.concatenate([np.asarray(s, np.int32).reshape(-1)
                                    for s in word_id_seqs if len(s) > 0])
            all_t = np.concatenate([np.asarray(s, np.int32).reshape(-1)
                                    for s in tag_id_seqs if len(s) > 0])
            assert all_w.min() >= 0 and all_w.max() <= self.word_pad_idx, \
                "word id out of range"
            assert all_t.min() >= 0 and all_t.max() <= self.tag_pad_idx, \
                "tag id out of range"
            padded_w[mask] = all_w
            padded_t[mask] = all_t

        n_tok = batch * t_max
        # Tile choice: big tiles to amortize per-step overhead, but never a
        # single giant tile when the input is large enough for 2 steps (v7x).
        tn = min(self.token_tile, _round_up(max((n_tok + 1) // 2, 1), _LANE))
        n_pad = _round_up(n_tok, tn)

        # Pack word ids + pre-offset tag ids into one (n_pad, 2) array ->
        # a single contiguous id DMA per grid step.
        ids = np.empty((n_pad, 2), dtype=np.int32)
        ids[:, 0] = self.word_pad_idx
        ids[:, 1] = self.tag_pad_idx + self.vw1
        ids[:n_tok, 0] = padded_w.reshape(-1)
        ids[:n_tok, 1] = padded_t.reshape(-1) + self.vw1

        out = self._get_fn(n_pad, tn)(jnp.asarray(ids), self.fused_table)
        # (n_pad, D) -> drop flat padding -> (B, Tmax, D); no transpose needed.
        token_repr = out[:n_tok].reshape(batch, t_max, self.d_out)
        return token_repr, lengths


def _reference(word_id_seqs, tag_id_seqs, word_table, pos_table):
    lengths = [len(s) for s in word_id_seqs]
    batch, t_max = len(word_id_seqs), max(lengths)
    pw = np.full((batch, t_max), N_WORDS, dtype=np.int32)
    pt = np.full((batch, t_max), N_TAGS, dtype=np.int32)
    for b in range(batch):
        pw[b, : lengths[b]] = np.asarray(word_id_seqs[b])
        pt[b, : lengths[b]] = np.asarray(tag_id_seqs[b])
    w = jnp.take(word_table, jnp.asarray(pw), axis=0)
    t = jnp.take(pos_table, jnp.asarray(pt), axis=0)
    return jnp.concatenate([w, t], axis=2)


if __name__ == "__main__":
    key = jax.random.PRNGKey(0)
    k_w, k_p, k_ids_w, k_ids_t = jax.random.split(key, 4)

    # Deterministic parameter init, mirroring initialize_parameters():
    #   word_embs.weight ~ U(-0.01, 0.01)   (uniform_ overwrites the padding row too)
    #   pos_embs.weight  ~ U(-0.01, 0.01), padding row (index N_TAGS) zeroed afterwards
    word_table = jax.random.uniform(k_w, (N_WORDS + 1, WORD_EMBS_DIM),
                                    minval=-0.01, maxval=0.01, dtype=jnp.float32)
    pos_table = jax.random.uniform(k_p, (N_TAGS + 1, POS_EMBS_DIM),
                                   minval=-0.01, maxval=0.01, dtype=jnp.float32)
    pos_table = pos_table.at[N_TAGS].set(0.0)

    # Small batch: 2 sentences of lengths 8 and 5 (variable-length, like the module).
    lengths_in = [8, 5]
    all_w = jax.random.randint(k_ids_w, (sum(lengths_in),), 0, N_WORDS)
    all_t = jax.random.randint(k_ids_t, (sum(lengths_in),), 0, N_TAGS)
    word_id_seqs, tag_id_seqs, off = [], [], 0
    for L in lengths_in:
        word_id_seqs.append(np.asarray(all_w[off:off + L], dtype=np.int32))
        tag_id_seqs.append(np.asarray(all_t[off:off + L], dtype=np.int32))
        off += L

    extractor = FeatureExtractor(word_table, pos_table)   # static setup hoisted
    token_repr, lengths = extractor(word_id_seqs, tag_id_seqs)
    token_repr = jax.block_until_ready(token_repr)

    ref = _reference(word_id_seqs, tag_id_seqs, word_table, pos_table)
    assert token_repr.shape == (2, 8, OUT_DIM), token_repr.shape
    assert lengths == lengths_in
    np.testing.assert_allclose(np.asarray(token_repr), np.asarray(ref),
                               rtol=1e-6, atol=1e-6)
    print("KERNEL_OK")
</pallas_src>

<mosaic_0001>
module attributes {stable_mosaic.version = 11 : i64} {
  func.func @_feature_kernel(%arg0: i32, %arg1: memref<128x2xi32, #tpu.memory_space<vmem>>, %arg2: memref<88x48xf32, #tpu.memory_space<vmem>>, %arg3: memref<128x48xf32, #tpu.memory_space<vmem>>) attributes {dimension_semantics = [#tpu.dimension_semantics<parallel>], iteration_bounds = array<i64: 1>, scalar_prefetch = 0 : i64, scratch_operands = 0 : i64, tpu.core_type = #tpu.core_type<tc>, window_params = [{transform_indices = @transform_0, window_bounds = array<i64: 128, 2>}, {pipeline_mode = #tpu.pipeline_mode<synchronous>, transform_indices = @transform_1, window_bounds = array<i64: 88, 48>}, {transform_indices = @transform_2, window_bounds = array<i64: 128, 48>}]} {
    %c0 = arith.constant 0 : index
    %c0_0 = arith.constant 0 : index
    %0 = vector.load %arg1[%c0, %c0_0] : memref<128x2xi32, #tpu.memory_space<vmem>>, vector<128x1xi32>
    %c0_1 = arith.constant 0 : index
    %c1 = arith.constant 1 : index
    %1 = vector.load %arg1[%c0_1, %c1] : memref<128x2xi32, #tpu.memory_space<vmem>>, vector<128x1xi32>
    %2 = tpu.iota {dimensions = array<i32: 1>} : vector<128x88xi32>
    %3 = vector.broadcast %0 : vector<128x1xi32> to vector<128x88xi32>
    %4 = arith.cmpi eq, %2, %3 : vector<128x88xi32>
    %5 = vector.broadcast %1 : vector<128x1xi32> to vector<128x88xi32>
    %6 = arith.cmpi eq, %2, %5 : vector<128x88xi32>
    %7 = arith.ori %4, %6 : vector<128x88xi1>
    %8 = arith.extui %7 : vector<128x88xi1> to vector<128x88xi32>
    %9 = arith.sitofp %8 : vector<128x88xi32> to vector<128x88xf32>
    %c0_2 = arith.constant 0 : index
    %c0_3 = arith.constant 0 : index
    %10 = vector.load %arg2[%c0_2, %c0_3] : memref<88x48xf32, #tpu.memory_space<vmem>>, vector<88x48xf32>
    %cst = arith.constant dense<0.000000e+00> : vector<128x48xf32>
    %11 = tpu.matmul %9, %10, %cst {dimension_numbers = #tpu.dot_dimension_numbers<[1], [0], [0], [1], [0, 0, 1, 1], [], []>} : vector<128x88xf32>, vector<88x48xf32>, vector<128x48xf32> -> vector<128x48xf32>
    %c0_4 = arith.constant 0 : index
    %c0_5 = arith.constant 0 : index
    %12 = vector.load %arg3[%c0_4, %c0_5] : memref<128x48xf32, #tpu.memory_space<vmem>>, vector<128x48xf32>
    tpu.vector_store %arg3[%c0_4, %c0_5], %11 {strides = array<i32>} : memref<128x48xf32, #tpu.memory_space<vmem>>, vector<128x48xf32>,
    return
  }
  func.func @transform_0(%arg0: i32) -> (i32, i32) {
    %c0_i32 = arith.constant 0 : i32
    %c0_i32_0 = arith.constant 0 : i32
    return %arg0, %c0_i32 : i32, i32
  }
  func.func @transform_1(%arg0: i32) -> (i32, i32) {
    %c0_i32 = arith.constant 0 : i32
    %c0_i32_0 = arith.constant 0 : i32
    %c0_i32_1 = arith.constant 0 : i32
    return %c0_i32, %c0_i32_0 : i32, i32
  }
  func.func @transform_2(%arg0: i32) -> (i32, i32) {
    %c0_i32 = arith.constant 0 : i32
    %c0_i32_0 = arith.constant 0 : i32
    return %arg0, %c0_i32 : i32, i32
  }
}

</mosaic_0001>

<bundles_post_ra>
// kernel: tpu_custom_call.1
= control target key start
LH: loop header
LB: loop body
LE: loop exit
PB: predicated region body
PF: predicated region fallthrough
CT: control target
= control target key end

     0   :  { %v435_v0 = vmov 1   ;;  %v436_v1 = vmov 0   ;;  %v27_v31 = vlaneseq  ;;  %vm216_vm2 = vcmask 719872   ;;  %s680_s0 = inlined_call_operand.vmem [shape: s32[128,2], index: 0, kind: input, shape index: {}]   ;;  %s681_s1 = inlined_call_operand.vmem [shape: f32[88,48], index: 1, kind: input, shape index: {}]   ;;  %s682_s2 = inlined_call_operand.vmem [shape: f32[128,48], index: 2, kind: output, shape index: {}]  }
   0x1   :  { %420 = vset.pattern.permute.xlu1 %v435_v0  ;;  %419 = vset.pattern.permute.xlu0 %v436_v1  ;;  %v19_v2 = vld [vmem:[%s680_s0 + $0x40] sm:$0xff]  ;;  %v25_v6 = vld [vmem:[%s680_s0 + $0x70] sm:$0xff]  ;;  %v20_v7 = vld [vmem:[%s680_s0 + $0x48] sm:$0xff]  ;;  %v437_v36 = vmov 0.0  }
   0x2   :  { %v11_v3 = vld [vmem:[%s680_s0] sm:$0xff]  ;;  %118 = vperm.xlu1 %420, %v19_v2   ;;  %54 = vperm.xlu0 %419, %v19_v2   ;;  %v24_v8 = vld [vmem:[%s680_s0 + $0x68] sm:$0xff]  ;;  %v21_v11 = vld [vmem:[%s680_s0 + $0x50] sm:$0xff]  ;;  %v550_v33 = vand.u32 127, %v27_v31 }
   0x3   :  { %421 = vset.pattern.permute.xlu2 %v436_v1  ;;  %v23_v4 = vld [vmem:[%s680_s0 + $0x60] sm:$0xff]  ;;  %v12_v9 = vld [vmem:[%s680_s0 + $0x8] sm:$0xff]  ;;  %v13_v12 = vld [vmem:[%s680_s0 + $0x10] sm:$0xff] }
   0x4   :  { %30 = vperm.xlu2 %421, %v11_v3   ;;  %v15_v5 = vld [vmem:[%s680_s0 + $0x20] sm:$0xff]  ;;  %v16_v10 = vld [vmem:[%s680_s0 + $0x28] sm:$0xff]  ;;  %v26_v13 = vld [vmem:[%s680_s0 + $0x78] sm:$0xff] }
   0x5   :  { %v17_v14 = vld [vmem:[%s680_s0 + $0x30] sm:$0xff]  ;;  %v14_v15 = vld [vmem:[%s680_s0 + $0x18] sm:$0xff]  ;;  %v214_v17 = vld [vmem:[%s681_s1 + $0x48] sm:$0xff] }
   0x6   :  { %v215_v16 = vld [vmem:[%s681_s1 + $0x50] sm:$0xff]  ;;  %v213_v18 = vld [vmem:[%s681_s1 + $0x40] sm:$0xff]  ;;  %v212_v19 = vld [vmem:[%s681_s1 + $0x38] sm:$0xff] }
   0x7   :  { %384 = vmatpush.msra.mxu2 %v215_v16  ;;  %385 = vmatpush.msra.mxu3 %v215_v16  ;;  %v22_v20 = vld [vmem:[%s680_s0 + $0x58] sm:$0xff]  ;;  %v211_v21 = vld [vmem:[%s681_s1 + $0x30] sm:$0xff]  ;;  %v210_v22 = vld [vmem:[%s681_s1 + $0x28] sm:$0xff] }
   0x8   :  { %383 = vmatpush.msra.mxu1 %v215_v16  ;;  %270 = vmatpush.msra.mxu0 %v215_v16  ;;  %v209_v23 = vld [vmem:[%s681_s1 + $0x20] sm:$0xff]  ;;  %v208_v24 = vld [vmem:[%s681_s1 + $0x18] sm:$0xff]  ;;  %v207_v25 = vld [vmem:[%s681_s1 + $0x10] sm:$0xff] }
   0x9   :  { %387 = vmatpush.msra.mxu2 %v214_v17  ;;  %388 = vmatpush.msra.mxu3 %v214_v17  ;;  %v206_v26 = vld [vmem:[%s681_s1 + $0x8] sm:$0xff]  ;;  %v205_v27 = vld [vmem:[%s681_s1] sm:$0xff]  ;;  %v18_v28 = vld [vmem:[%s680_s0 + $0x38] sm:$0xff] }
   0xa   :  { %130 = vperm.xlu1 %420, %v23_v4   ;;  %66 = vperm.xlu0 %419, %v23_v4  }
   0xb   :  { %386 = vmatpush.msra.mxu1 %v214_v17  ;;  %390 = vmatpush.msra.mxu2 %v213_v18 }
   0xc   :  { %42 = vperm.xlu2 %421, %v15_v5   ;;  %391 = vmatpush.msra.mxu3 %v213_v18 }
   0xd   :  { %393 = vmatpush.msra.mxu2 %v212_v19  ;;  %389 = vmatpush.msra.mxu1 %v213_v18 }
   0xe   :  { %394 = vmatpush.msra.mxu3 %v212_v19  ;;  %271 = vmatpush.msra.mxu0 %v214_v17 }
   0xf   :  { %396 = vmatpush.msra.mxu2 %v211_v21  ;;  %392 = vmatpush.msra.mxu1 %v212_v19 }
  0x10   :  { %397 = vmatpush.msra.mxu3 %v211_v21  ;;  %272 = vmatpush.msra.mxu0 %v213_v18 }
  0x11   :  { %399 = vmatpush.msra.mxu2 %v210_v22  ;;  %395 = vmatpush.msra.mxu1 %v211_v21 }
  0x12   :  { %72 = vperm.xlu0 %419, %v25_v6   ;;  %106 = vperm.xlu1 %420, %v15_v5  }
  0x13   :  { %400 = vmatpush.msra.mxu3 %v210_v22  ;;  %402 = vmatpush.msra.mxu2 %v209_v23 }
  0x14   :  { %57 = vperm.xlu2 %421, %v20_v7   ;;  %398 = vmatpush.msra.mxu1 %v210_v22 }
  0x15   :  { %403 = vmatpush.msra.mxu3 %v209_v23  ;;  %405 = vmatpush.msra.mxu2 %v208_v24 }
  0x16   :  { %401 = vmatpush.msra.mxu1 %v209_v23  ;;  %273 = vmatpush.msra.mxu0 %v212_v19 }
  0x17   :  { %406 = vmatpush.msra.mxu3 %v208_v24  ;;  %408 = vmatpush.msra.mxu2 %v207_v25 }
  0x18   :  { %404 = vmatpush.msra.mxu1 %v208_v24  ;;  %274 = vmatpush.msra.mxu0 %v211_v21 }
  0x19   :  { %409 = vmatpush.msra.mxu3 %v207_v25  ;;  %411 = vmatpush.msra.mxu2 %v206_v26 }
  0x1a   :  { %426 = vset.pattern.permute.xlu0 %v435_v0  ;;  %422 = vset.pattern.permute.xlu1 %v436_v1 }
  0x1b   :  { %69 = vperm.xlu1 %422, %v24_v8   ;;  %94 = vperm.xlu0 %426, %v11_v3  }
  0x1c   :  { %423 = vset.pattern.permute.xlu2 %v435_v0  ;;  %412 = vmatpush.msra.mxu3 %v206_v26 }
  0x1d   :  { %121 = vperm.xlu2 %423, %v20_v7   ;;  %407 = vmatpush.msra.mxu1 %v207_v25 }
  0x1e   :  { %414 = vmatpush.msra.mxu2 %v205_v27  ;;  %415 = vmatpush.msra.mxu3 %v205_v27 }
  0x1f   :  { %410 = vmatpush.msra.mxu1 %v206_v26  ;;  %275 = vmatpush.msra.mxu0 %v210_v22 }
  0x21   :  { %413 = vmatpush.msra.mxu1 %v205_v27  ;;  %276 = vmatpush.msra.mxu0 %v209_v23 }
  0x23   :  { %33 = vperm.xlu1 %422, %v12_v9   ;;  %133 = vperm.xlu0 %426, %v24_v8  }
  0x24   :  { %277 = vmatpush.msra.mxu0 %v208_v24 }
  0x25   :  { %424 = vset.pattern.permute.xlu2 %v436_v1 }
  0x26   :  { %45 = vperm.xlu2 %424, %v16_v10   ;;  %278 = vmatpush.msra.mxu0 %v207_v25 }
  0x28   :  { %279 = vmatpush.msra.mxu0 %v206_v26 }
  0x2a   :  { %280 = vmatpush.msra.mxu0 %v205_v27 }
  0x2b   :  { %425 = vset.pattern.permute.xlu1 %v435_v0  ;;  %97 = vperm.xlu0 %426, %v12_v9  }
  0x2c   :  { %109 = vperm.xlu1 %425, %v16_v10  }
  0x2e   :  { %60 = vperm.xlu2 %424, %v21_v11  }
  0x33   :  { %100 = vperm.xlu0 %426, %v13_v12  }
  0x34   :  { %124 = vperm.xlu1 %425, %v21_v11  }
  0x36   :  { %427 = vset.pattern.permute.xlu2 %v435_v0 }
  0x37   :  { %136 = vperm.xlu2 %427, %v25_v6  }
  0x3b   :  { %139 = vperm.xlu0 %426, %v26_v13  }
  0x3c   :  { %428 = vset.pattern.permute.xlu1 %v436_v1 }
  0x3d   :  { %36 = vperm.xlu1 %428, %v13_v12  }
  0x3f   :  { %429 = vset.pattern.permute.xlu2 %v436_v1 }
  0x40   :  { %48 = vperm.xlu2 %429, %v17_v14  }
  0x43   :  { %103 = vperm.xlu0 %426, %v14_v15  }
  0x45   :  { %430 = vset.pattern.permute.xlu1 %v435_v0 }
  0x46   :  { %112 = vperm.xlu1 %430, %v17_v14  }
  0x48   :  { %63 = vperm.xlu2 %429, %v22_v20  }
  0x4e   :  { %431 = vset.pattern.permute.xlu1 %v436_v1 }
  0x4f   :  { %75 = vperm.xlu1 %431, %v26_v13  }
  0x50   :  { %432 = vset.pattern.permute.xlu2 %v435_v0 }
  0x51   :  { %127 = vperm.xlu2 %432, %v22_v20  }
  0x57   :  { %39 = vperm.xlu1 %431, %v14_v15  }
  0x59   :  { %433 = vset.pattern.permute.xlu2 %v436_v1 }
  0x5a   :  { %51 = vperm.xlu2 %433, %v18_v28  }
  0x5e   :  { %v31_v29 = vpop.permute.xlu2 %30 }
  0x5f   :  { %434 = vset.pattern.permute.xlu1 %v435_v0  ;;  %vm77_vm13 = vcmp.eq.s32.totalorder %v550_v33, %v31_v29 }
  0x60   :  { %115 = vperm.xlu1 %434, %v18_v28  }
  0x66   :  { %v43_v30 = vpop.permute.xlu2 %42 }
  0x67   :  { %vm81_vm10 = vcmp.eq.s32.totalorder %v550_v33, %v43_v30 }
  0x6e   :  { %v58_v32 = vpop.permute.xlu2 %57 }
  0x6f   :  { %vm86_vm4 = vcmp.eq.s32.totalorder %v550_v33, %v58_v32 }
  0x74   :  { %v119_v34 = vpop.permute.xlu1 %118  ;;  %v55_v35 = vpop.permute.xlu0 %54 }
  0x75   :  { %vm149_vm0 = vcmp.eq.s32.totalorder %v550_v33, %v119_v34  ;;  %vm85_vm1 = vcmp.eq.s32.totalorder %v550_v33, %v55_v35 }
  0x76   :  { %vm165_vm3 = vmor %vm85_vm1, %vm149_vm0 }
  0x77   :  { %v359_v37 = vsel %vm165_vm3, 1.0, %v437_v36  ;;  %v122_v38 = vpop.permute.xlu2 %121 }
  0x78   :  { %375 = vmatmul.msk.f32.vlgmr.msra.gmra.mxu2 %vm216_vm2, %v359_v37  ;;  %vm150_vm5 = vcmp.eq.s32.totalorder %v550_v33, %v122_v38 }
  0x79   :  { %vm166_vm6 = vmor %vm86_vm4, %vm150_vm5 }
  0x7a   :  { %v360_v41 = vsel %vm166_vm6, 1.0, %v437_v36 }
  0x7c   :  { %v131_v39 = vpop.permute.xlu1 %130  ;;  %v67_v40 = vpop.permute.xlu0 %66 }
  0x7d   :  { %vm153_vm7 = vcmp.eq.s32.totalorder %v550_v33, %v131_v39  ;;  %vm89_vm8 = vcmp.eq.s32.totalorder %v550_v33, %v67_v40 }
  0x7e   :  { %vm169_vm9 = vmor %vm89_vm8, %vm153_vm7 }
  0x7f   :  { %v363_v42 = vsel %vm169_vm9, 1.0, %v437_v36 }
  0x80   :  { %376 = vmatmul.msk.f32.gmra.mxu2 %vm216_vm2, %v360_v41  ;;  %379 = vmatmul.msk.f32.vlgmr.msra.gmra.mxu3 %vm216_vm2, %v363_v42  ;;  %v46_v43 = vpop.permute.xlu2 %45 }
  0x81   :  { %vm82_vm6 = vcmp.eq.s32.totalorder %v550_v33, %v46_v43 }
  0x84   :  { %v107_v44 = vpop.permute.xlu1 %106  ;;  %v73_v45 = vpop.permute.xlu0 %72 }
  0x85   :  { %vm145_vm11 = vcmp.eq.s32.totalorder %v550_v33, %v107_v44  ;;  %vm91_vm4 = vcmp.eq.s32.totalorder %v550_v33, %v73_v45 }
  0x86   :  { %vm161_vm12 = vmor %vm81_vm10, %vm145_vm11 }
  0x87   :  { %v355_v46 = vsel %vm161_vm12, 1.0, %v437_v36 }
  0x88   :  { %371 = vmatmul.msk.f32.vlgmr.msra.gmra.mxu1 %vm216_vm2, %v355_v46  ;;  %v61_v47 = vpop.permute.xlu2 %60 }
  0x8d   :  { %v70_v48 = vpop.permute.xlu1 %69  ;;  %v95_v49 = vpop.permute.xlu0 %94 }
  0x8e   :  { %vm141_vm14 = vcmp.eq.s32.totalorder %v550_v33, %v95_v49  ;;  %vm90_vm0 = vcmp.eq.s32.totalorder %v550_v33, %v70_v48 }
  0x8f   :  { %vm157_vm15 = vmor %vm77_vm13, %vm141_vm14  ;;  %vm87_vm13 = vcmp.eq.s32.totalorder %v550_v33, %v61_v47 }
  0x90   :  { %v351_v50 = vsel %vm157_vm15, 1.0, %v437_v36 }
  0x91   :  { %367 = vmatmul.msk.f32.vlgmr.msra.gmra.mxu0 %vm216_vm2, %v351_v50  ;;  %v137_v51 = vpop.permute.xlu2 %136 }
  0x92   :  { %vm155_vm5 = vcmp.eq.s32.totalorder %v550_v33, %v137_v51 }
  0x93   :  { %vm171_vm7 = vmor %vm91_vm4, %vm155_vm5 }
  0x94   :  { %v365_v59 = vsel %vm171_vm7, 1.0, %v437_v36 }
  0x95   :  { %v34_v52 = vpop.permute.xlu1 %33  ;;  %v134_v53 = vpop.permute.xlu0 %133 }
  0x96   :  { %vm154_vm1 = vcmp.eq.s32.totalorder %v550_v33, %v134_v53  ;;  %vm78_vm8 = vcmp.eq.s32.totalorder %v550_v33, %v34_v52 }
  0x97   :  { %vm170_vm3 = vmor %vm90_vm0, %vm154_vm1 }
  0x98   :  { %v364_v54 = vsel %vm170_vm3, 1.0, %v437_v36 }
  0x99   :  { %380 = vmatmul.msk.f32.gmra.mxu3 %vm216_vm2, %v364_v54 }
  0x9a   :  { %v49_v55 = vpop.permute.xlu2 %48 }
  0x9b   :  { %vm83_vm7 = vcmp.eq.s32.totalorder %v550_v33, %v49_v55 }
  0x9d   :  { %v98_v56 = vpop.permute.xlu0 %97 }
  0x9e   :  { %vm142_vm9 = vcmp.eq.s32.totalorder %v550_v33, %v98_v56  ;;  %v110_v57 = vpop.permute.xlu1 %109 }
  0x9f   :  { %vm158_vm10 = vmor %vm78_vm8, %vm142_vm9  ;;  %vm146_vm11 = vcmp.eq.s32.totalorder %v550_v33, %v110_v57 }
  0xa0   :  { %vm162_vm12 = vmor %vm82_vm6, %vm146_vm11  ;;  %v352_v58 = vsel %vm158_vm10, 1.0, %v437_v36 }
  0xa1   :  { %368 = vmatmul.msk.f32.gmra.mxu0 %vm216_vm2, %v352_v58  ;;  %381 = vmatmul.msk.f32.gmra.mxu3 %vm216_vm2, %v365_v59  ;;  %v356_v60 = vsel %vm162_vm12, 1.0, %v437_v36 }
  0xa2   :  { %372 = vmatmul.msk.f32.gmra.mxu1 %vm216_vm2, %v356_v60  ;;  %v64_v61 = vpop.permute.xlu2 %63 }
  0xa3   :  { %vm88_vm0 = vcmp.eq.s32.totalorder %v550_v33, %v64_v61 }
  0xa5   :  { %v101_v1 = vpop.permute.xlu0 %100 }
  0xa6   :  { %v125_v62 = vpop.permute.xlu1 %124  ;;  %vm143_vm4 = vcmp.eq.s32.totalorder %v550_v33, %v101_v1 }
  0xa7   :  { %vm151_vm14 = vcmp.eq.s32.totalorder %v550_v33, %v125_v62 }
  0xa8   :  { %vm167_vm15 = vmor %vm87_vm13, %vm151_vm14 }
  0xa9   :  { %v361_v63 = vsel %vm167_vm15, 1.0, %v437_v36 }
  0xaa   :  { %377 = vmatmul.msk.f32.gmra.mxu2 %vm216_vm2, %v361_v63 }
  0xab   :  { %v128_v0 = vpop.permute.xlu2 %127 }
  0xac   :  { %vm152_vm1 = vcmp.eq.s32.totalorder %v550_v33, %v128_v0 }
  0xad   :  { %vm168_vm3 = vmor %vm88_vm0, %vm152_vm1  ;;  %v140_v7 = vpop.permute.xlu0 %139 }
  0xae   :  { %v362_v3 = vsel %vm168_vm3, 1.0, %v437_v36  ;;  %vm156_vm10 = vcmp.eq.s32.totalorder %v550_v33, %v140_v7 }
  0xaf   :  { %v37_v2 = vpop.permute.xlu1 %36 }
  0xb0   :  { %vm79_vm5 = vcmp.eq.s32.totalorder %v550_v33, %v37_v2 }
  0xb1   :  { %vm159_vm6 = vmor %vm79_vm5, %vm143_vm4  ;;  %vm330_vm4 = vcmask 392192  }
  0xb2   :  { %v353_v4 = vsel %vm159_vm6, 1.0, %v437_v36  ;;  %378 = vmatmul.msk.f32.gmra.mxu2 %vm216_vm2, %v362_v3 }
  0xb3   :  { %369 = vmatmul.msk.f32.gmra.mxu0 %vm216_vm2, %v353_v4 }
  0xb4   :  { %v52_v13 = vpop.permute.xlu2 %51 }
  0xb5   :  { %v104_v10 = vpop.permute.xlu0 %103  ;;  %vm84_vm0 = vcmp.eq.s32.totalorder %v550_v33, %v52_v13 }
  0xb6   :  { %vm144_vm13 = vcmp.eq.s32.totalorder %v550_v33, %v104_v10 }
  0xb8   :  { %v113_v5 = vpop.permute.xlu1 %112 }
  0xb9   :  { %vm147_vm8 = vcmp.eq.s32.totalorder %v550_v33, %v113_v5 }
  0xba   :  { %vm163_vm9 = vmor %vm83_vm7, %vm147_vm8 }
  0xbb   :  { %v357_v6 = vsel %vm163_vm9, 1.0, %v437_v36 }
  0xbc   :  { %373 = vmatmul.msk.f32.gmra.mxu1 %vm216_vm2, %v357_v6 }
  0xc1   :  { %v76_v8 = vpop.permute.xlu1 %75 }
  0xc2   :  { %vm92_vm11 = vcmp.eq.s32.totalorder %v550_v33, %v76_v8 }
  0xc3   :  { %vm172_vm12 = vmor %vm92_vm11, %vm156_vm10 }
  0xc4   :  { %v366_v9 = vsel %vm172_vm12, 1.0, %v437_v36 }
  0xc5   :  { %382 = vmatmul.msk.f32.gmra.mxu3 %vm216_vm2, %v366_v9 }
  0xc9   :  { %v40_v11 = vpop.permute.xlu1 %39 }
  0xca   :  { %vm80_vm14 = vcmp.eq.s32.totalorder %v550_v33, %v40_v11 }
  0xcb   :  { %vm160_vm15 = vmor %vm80_vm14, %vm144_vm13 }
  0xcc   :  { %v354_v12 = vsel %vm160_vm15, 1.0, %v437_v36 }
  0xcd   :  { %370 = vmatmul.msk.f32.gmra.mxu0 %vm216_vm2, %v354_v12 }
  0xd2   :  { %v116_v14 = vpop.permute.xlu1 %115 }
  0xd3   :  { %vm148_vm1 = vcmp.eq.s32.totalorder %v550_v33, %v116_v14 }
  0xd4   :  { %vm164_vm3 = vmor %vm84_vm0, %vm148_vm1 }
  0xd5   :  { %v358_v15 = vsel %vm164_vm3, 1.0, %v437_v36 }
  0xd6   :  { %374 = vmatmul.msk.f32.gmra.mxu1 %vm216_vm2, %v358_v15 }
  0xfb   :  { %v306_v16 = vpop.f32.mrf.mxu2 }
  0xfc   :  { %339 = vst.msk [vmem:[%s682_s2 + $0x40] sm:$0xff] %vm330_vm4, %v306_v16 }
 0x103   :  { %v309_v17 = vpop.f32.mrf.mxu2  ;;  %v318_v18 = vpop.f32.mrf.mxu3 }
 0x104   :  { %340 = vst.msk [vmem:[%s682_s2 + $0x48] sm:$0xff] %vm330_vm4, %v309_v17 }
 0x105   :  { %343 = vst.msk [vmem:[%s682_s2 + $0x60] sm:$0xff] %vm330_vm4, %v318_v18  ;;  %v294_v19 = vpop.f32.mrf.mxu1 }
 0x106   :  { %335 = vst.msk [vmem:[%s682_s2 + $0x20] sm:$0xff] %vm330_vm4, %v294_v19 }
 0x10e   :  { %v282_v20 = vpop.f32.mrf.mxu0 }
 0x10f   :  { %331 = vst.msk [vmem:[%s682_s2] sm:$0xff] %vm330_vm4, %v282_v20 }
 0x11c   :  { %v321_v21 = vpop.f32.mrf.mxu3 }
 0x11d   :  { %344 = vst.msk [vmem:[%s682_s2 + $0x68] sm:$0xff] %vm330_vm4, %v321_v21 }
 0x11e   :  { %v285_v22 = vpop.f32.mrf.mxu0 }
 0x11f   :  { %332 = vst.msk [vmem:[%s682_s2 + $0x8] sm:$0xff] %vm330_vm4, %v285_v22  ;;  %v297_v23 = vpop.f32.mrf.mxu1 }
 0x120   :  { %336 = vst.msk [vmem:[%s682_s2 + $0x28] sm:$0xff] %vm330_vm4, %v297_v23 }
 0x124   :  { %v324_v24 = vpop.f32.mrf.mxu3 }
 0x125   :  { %345 = vst.msk [vmem:[%s682_s2 + $0x70] sm:$0xff] %vm330_vm4, %v324_v24 }
 0x12d   :  { %v312_v25 = vpop.f32.mrf.mxu2 }
 0x12e   :  { %341 = vst.msk [vmem:[%s682_s2 + $0x50] sm:$0xff] %vm330_vm4, %v312_v25 }
 0x130   :  { %v288_v26 = vpop.f32.mrf.mxu0 }
 0x131   :  { %333 = vst.msk [vmem:[%s682_s2 + $0x10] sm:$0xff] %vm330_vm4, %v288_v26 }
 0x135   :  { %v315_v27 = vpop.f32.mrf.mxu2 }
 0x136   :  { %342 = vst.msk [vmem:[%s682_s2 + $0x58] sm:$0xff] %vm330_vm4, %v315_v27 }
 0x139   :  { %v300_v28 = vpop.f32.mrf.mxu1 }
 0x13a   :  { %337 = vst.msk [vmem:[%s682_s2 + $0x30] sm:$0xff] %vm330_vm4, %v300_v28 }
 0x148   :  { %v327_v29 = vpop.f32.mrf.mxu3 }
 0x149   :  { %346 = vst.msk [vmem:[%s682_s2 + $0x78] sm:$0xff] %vm330_vm4, %v327_v29 }
 0x14a   :  { %v291_v30 = vpop.f32.mrf.mxu0 }
 0x14b   :  { %334 = vst.msk [vmem:[%s682_s2 + $0x18] sm:$0xff] %vm330_vm4, %v291_v30 }
 0x153   :  { %v303_v31 = vpop.f32.mrf.mxu1 }
 0x154   :  { %338 = vst.msk [vmem:[%s682_s2 + $0x38] sm:$0xff] %vm330_vm4, %v303_v31 }

</bundles_post_ra>
